<compile_context>
chip_gen: v7x
topology: tpu7x:2x2x1
jax: 0.10.0
libtpu: 0.0.40
codegen_flags: <defaults>
</compile_context>

<pallas_src>
import math
import numpy as np
import jax
import jax.numpy as jnp
from jax.experimental import pallas as pl
from jax.experimental.pallas import tpu as pltpu

INIT_STD = 0.1
MIN_STD = 0.01
LN_EPS = 1e-5
_LOG_2PI = math.log(2.0 * math.pi)
_LOG_2 = math.log(2.0)


def _softplus(x):
    # numerically stable softplus
    return jnp.maximum(x, 0.0) + jnp.log1p(jnp.exp(-jnp.abs(x)))


def _round_up(n, m):
    return ((n + m - 1) // m) * m


def actor_kernel(xe_ref, w0_ref, w1_ref, wh_ref, vec_ref, out_ref):
    in_dim = w0_ref.shape[0]
    hidden = w0_ref.shape[1]
    two_a = wh_ref.shape[1]
    a_dim = two_a // 2

    # Packed activation slab: [x | eps].
    xe = xe_ref[...]
    x = xe[:, :in_dim]
    eps = xe[:, in_dim:in_dim + a_dim]

    # Packed per-feature vectors (one load): rows are
    # b0, g0, be0, b1, g1, be1, bhead(=[bm|bs] padded), zero-pad.
    vecs = vec_ref[...]
    b0 = vecs[0:1, :hidden]
    g0 = vecs[1:2, :hidden]
    be0 = vecs[2:3, :hidden]
    b1 = vecs[3:4, :hidden]
    g1 = vecs[4:5, :hidden]
    be1 = vecs[5:6, :hidden]
    bh = vecs[6:7, :two_a]

    def layernorm(h, g, b):
        # Parallel-moment form: both reductions are independent XLU ops.
        mu = jnp.mean(h, axis=-1, keepdims=True)
        ex2 = jnp.mean(h * h, axis=-1, keepdims=True)
        var = jnp.maximum(ex2 - mu * mu, 0.0)
        return (h - mu) * jax.lax.rsqrt(var + LN_EPS) * g + b

    # MLP trunk: relu after every layer (Linear AND LayerNorm), as in PyTorch loop.
    h = jnp.dot(x, w0_ref[...], preferred_element_type=jnp.float32) + b0
    h = jnp.maximum(h, 0.0)
    h = jnp.maximum(layernorm(h, g0, be0), 0.0)
    h = jnp.dot(h, w1_ref[...], preferred_element_type=jnp.float32) + b1
    h = jnp.maximum(h, 0.0)
    h = jnp.maximum(layernorm(h, g1, be1), 0.0)

    # Fused heads: single matmul for [mean_layer | log_std_layer].
    head = jnp.dot(h, wh_ref[...], preferred_element_type=jnp.float32) + bh
    mean = jnp.tanh(head[:, :a_dim])
    log_std = head[:, a_dim:]
    std = _softplus(log_std) + MIN_STD

    # Sample from TanhTransform(Normal(mean, std)) via reparameterization.
    z = mean + std * eps
    action = jnp.tanh(z)

    # Normal(mean, std).log_prob(z); note (z - mean)/std == eps.
    log_prob_z = -0.5 * eps * eps - jnp.log(std) - 0.5 * jnp.float32(_LOG_2PI)
    # TanhTransform.log_abs_det_jacobian(z, action) (PyTorch formula).
    ladj = 2.0 * (jnp.float32(_LOG_2) - z - _softplus(-2.0 * z))
    logp = log_prob_z - ladj

    # Single lane-dense store: [action | log_prob].
    out_ref[...] = jnp.concatenate([action, logp], axis=-1)


def actor_forward(x, params, eps, *, tile_b=512):
    B, in_dim = x.shape
    H = params["w0"].shape[1]
    A = params["wm"].shape[1]

    # Fuse head params: [mean | log_std].
    wh = jnp.concatenate([params["wm"], params["ws"]], axis=1)          # (H, 2A)
    bh = jnp.concatenate([params["bm"], params["bs"]], axis=1)          # (1, 2A)

    # Pack all small (1, N) vectors into one (8, W) slab -> a single DMA.
    W = max(H, 2 * A)

    def _padw(v):
        return jnp.pad(v.astype(jnp.float32), ((0, 0), (0, W - v.shape[1])))

    vecs = jnp.concatenate([
        _padw(params["b0"]), _padw(params["g0"]), _padw(params["be0"]),
        _padw(params["b1"]), _padw(params["g1"]), _padw(params["be1"]),
        _padw(bh), jnp.zeros((1, W), jnp.float32)], axis=0)             # (8, W)

    # Pack x and eps into one activation slab.
    xe = jnp.concatenate([x.astype(jnp.float32), eps.astype(jnp.float32)], axis=1)

    # Batch tiling: tile rows must be a multiple of 8; pad batch if needed.
    tile_b = max(8, _round_up(min(tile_b, _round_up(B, 8)), 8))
    B_pad = _round_up(B, tile_b)
    if B_pad != B:
        xe = jnp.pad(xe, ((0, B_pad - B), (0, 0)))
    grid = (B_pad // tile_b,)

    d_xe = in_dim + A
    out = pl.pallas_call(
        actor_kernel,
        out_shape=jax.ShapeDtypeStruct((B_pad, 2 * A), jnp.float32),
        grid_spec=pltpu.PrefetchScalarGridSpec(
            num_scalar_prefetch=0,
            grid=grid,
            in_specs=[
                pl.BlockSpec((tile_b, d_xe), lambda i: (i, 0)),   # activations: tiled
                pl.BlockSpec((in_dim, H), lambda i: (0, 0)),      # weights: resident
                pl.BlockSpec((H, H), lambda i: (0, 0)),
                pl.BlockSpec((H, 2 * A), lambda i: (0, 0)),
                pl.BlockSpec((8, W), lambda i: (0, 0)),
            ],
            out_specs=pl.BlockSpec((tile_b, 2 * A), lambda i: (i, 0)),
        ),
        compiler_params=pltpu.CompilerParams(
            dimension_semantics=("parallel",),
            vmem_limit_bytes=32 * 1024 * 1024,
        ),
    )(xe, params["w0"], params["w1"], wh, vecs)

    action = out[:B, :A]
    logp = out[:B, A:]
    return action, logp


def actor_reference(x, params, eps):
    """Pure-JAX reference of the same forward (for correctness check)."""
    hp = jax.lax.Precision.HIGHEST
    h = x.astype(jnp.float32)
    for w, b, g, be in ((params["w0"], params["b0"], params["g0"], params["be0"]),
                        (params["w1"], params["b1"], params["g1"], params["be1"])):
        h = jnp.maximum(jnp.dot(h, w, precision=hp) + b, 0.0)
        mu = jnp.mean(h, axis=-1, keepdims=True)
        var = jnp.mean((h - mu) ** 2, axis=-1, keepdims=True)
        h = (h - mu) * jax.lax.rsqrt(var + LN_EPS) * g + be
        h = jnp.maximum(h, 0.0)
    mean = jnp.tanh(jnp.dot(h, params["wm"], precision=hp) + params["bm"])
    log_std = jnp.dot(h, params["ws"], precision=hp) + params["bs"]
    std = jax.nn.softplus(log_std) + MIN_STD
    z = mean + std * eps
    action = jnp.tanh(z)
    logp = (-0.5 * eps * eps - jnp.log(std) - 0.5 * _LOG_2PI
            - 2.0 * (_LOG_2 - z - jax.nn.softplus(-2.0 * z)))
    return action, logp


def init_params(key, input_dim, hidden_dim, action_dim):
    ks = jax.random.split(key, 6)

    def lin(k, fan_in, fan_out):
        bound = 1.0 / math.sqrt(fan_in)
        kw, kb = jax.random.split(k)
        w = jax.random.uniform(kw, (fan_in, fan_out), jnp.float32, -bound, bound)
        b = jax.random.uniform(kb, (1, fan_out), jnp.float32, -bound, bound)
        return w, b

    w0, b0 = lin(ks[0], input_dim, hidden_dim)
    w1, b1 = lin(ks[1], hidden_dim, hidden_dim)
    wm, bm = lin(ks[2], hidden_dim, action_dim)
    # log_std_layer: weight filled with 0, bias filled with log(exp(init_std) - 1)
    ws = jnp.zeros((hidden_dim, action_dim), jnp.float32)
    bs = jnp.full((1, action_dim), np.log(np.exp(INIT_STD) - 1.0), jnp.float32)
    return dict(
        w0=w0, b0=b0,
        g0=jnp.ones((1, hidden_dim), jnp.float32),
        be0=jnp.zeros((1, hidden_dim), jnp.float32),
        w1=w1, b1=b1,
        g1=jnp.ones((1, hidden_dim), jnp.float32),
        be1=jnp.zeros((1, hidden_dim), jnp.float32),
        wm=wm, bm=bm, ws=ws, bs=bs,
    )


if __name__ == "__main__":
    B, INPUT_DIM, HIDDEN_DIM, ACTION_DIM = 8, 32, 32, 8

    root = jax.random.PRNGKey(0)
    k_params, k_x, k_eps = jax.random.split(root, 3)

    params = init_params(k_params, INPUT_DIM, HIDDEN_DIM, ACTION_DIM)
    x = jax.random.normal(k_x, (B, INPUT_DIM), jnp.float32)
    eps = jax.random.normal(k_eps, (B, ACTION_DIM), jnp.float32)

    action, log_prob = actor_forward(x, params, eps)
    jax.block_until_ready((action, log_prob))

    assert action.shape == (B, ACTION_DIM)
    assert log_prob.shape == (B, ACTION_DIM)
    assert bool(jnp.all(jnp.isfinite(action))) and bool(jnp.all(jnp.isfinite(log_prob)))

    # Correctness vs pure-JAX reference.
    ref_a, ref_lp = actor_reference(x, params, eps)
    assert bool(jnp.allclose(action, ref_a, atol=1e-3, rtol=1e-3))
    assert bool(jnp.allclose(log_prob, ref_lp, atol=1e-3, rtol=1e-3))

    # Exercise the gridded / padded-batch path (grid > 1, batch not multiple of tile).
    B2 = 20
    x2 = jax.random.normal(jax.random.PRNGKey(1), (B2, INPUT_DIM), jnp.float32)
    eps2 = jax.random.normal(jax.random.PRNGKey(2), (B2, ACTION_DIM), jnp.float32)
    a2, lp2 = actor_forward(x2, params, eps2, tile_b=8)
    jax.block_until_ready((a2, lp2))
    ra2, rlp2 = actor_reference(x2, params, eps2)
    assert a2.shape == (B2, ACTION_DIM) and lp2.shape == (B2, ACTION_DIM)
    assert bool(jnp.allclose(a2, ra2, atol=1e-3, rtol=1e-3))
    assert bool(jnp.allclose(lp2, rlp2, atol=1e-3, rtol=1e-3))

    print("KERNEL_OK")
</pallas_src>

<mosaic_0001>
module attributes {stable_mosaic.version = 11 : i64} {
  func.func @actor_kernel(%arg0: i32, %arg1: memref<8x40xf32, #tpu.memory_space<vmem>>, %arg2: memref<32x32xf32, #tpu.memory_space<vmem>>, %arg3: memref<32x32xf32, #tpu.memory_space<vmem>>, %arg4: memref<32x16xf32, #tpu.memory_space<vmem>>, %arg5: memref<8x32xf32, #tpu.memory_space<vmem>>, %arg6: memref<8x16xf32, #tpu.memory_space<vmem>>) attributes {dimension_semantics = [#tpu.dimension_semantics<parallel>], iteration_bounds = array<i64: 1>, scalar_prefetch = 0 : i64, scratch_operands = 0 : i64, tpu.core_type = #tpu.core_type<tc>, window_params = [{transform_indices = @transform_0, window_bounds = array<i64: 8, 40>}, {pipeline_mode = #tpu.pipeline_mode<synchronous>, transform_indices = @transform_1, window_bounds = array<i64: 32, 32>}, {pipeline_mode = #tpu.pipeline_mode<synchronous>, transform_indices = @transform_2, window_bounds = array<i64: 32, 32>}, {pipeline_mode = #tpu.pipeline_mode<synchronous>, transform_indices = @transform_3, window_bounds = array<i64: 32, 16>}, {pipeline_mode = #tpu.pipeline_mode<synchronous>, transform_indices = @transform_4, window_bounds = array<i64: 8, 32>}, {transform_indices = @transform_5, window_bounds = array<i64: 8, 16>}]} {
    %c0 = arith.constant 0 : index
    %c0_0 = arith.constant 0 : index
    %0 = vector.load %arg1[%c0, %c0_0] : memref<8x40xf32, #tpu.memory_space<vmem>>, vector<8x40xf32>
    %1 = vector.extract_strided_slice %0 {offsets = [0, 0], sizes = [8, 32], strides = [1, 1]} : vector<8x40xf32> to vector<8x32xf32>
    %2 = vector.extract_strided_slice %0 {offsets = [0, 32], sizes = [8, 8], strides = [1, 1]} : vector<8x40xf32> to vector<8x8xf32>
    %c0_1 = arith.constant 0 : index
    %c0_2 = arith.constant 0 : index
    %3 = vector.load %arg5[%c0_1, %c0_2] : memref<8x32xf32, #tpu.memory_space<vmem>>, vector<8x32xf32>
    %4 = vector.extract_strided_slice %3 {offsets = [0, 0], sizes = [1, 32], strides = [1, 1]} : vector<8x32xf32> to vector<1x32xf32>
    %5 = vector.extract_strided_slice %3 {offsets = [1, 0], sizes = [1, 32], strides = [1, 1]} : vector<8x32xf32> to vector<1x32xf32>
    %6 = vector.extract_strided_slice %3 {offsets = [2, 0], sizes = [1, 32], strides = [1, 1]} : vector<8x32xf32> to vector<1x32xf32>
    %7 = vector.extract_strided_slice %3 {offsets = [3, 0], sizes = [1, 32], strides = [1, 1]} : vector<8x32xf32> to vector<1x32xf32>
    %8 = vector.extract_strided_slice %3 {offsets = [4, 0], sizes = [1, 32], strides = [1, 1]} : vector<8x32xf32> to vector<1x32xf32>
    %9 = vector.extract_strided_slice %3 {offsets = [5, 0], sizes = [1, 32], strides = [1, 1]} : vector<8x32xf32> to vector<1x32xf32>
    %10 = vector.extract_strided_slice %3 {offsets = [6, 0], sizes = [1, 16], strides = [1, 1]} : vector<8x32xf32> to vector<1x16xf32>
    %c0_3 = arith.constant 0 : index
    %c0_4 = arith.constant 0 : index
    %11 = vector.load %arg2[%c0_3, %c0_4] : memref<32x32xf32, #tpu.memory_space<vmem>>, vector<32x32xf32>
    %cst = arith.constant dense<0.000000e+00> : vector<8x32xf32>
    %12 = tpu.matmul %1, %11, %cst {dimension_numbers = #tpu.dot_dimension_numbers<[1], [0], [0], [1], [0, 0, 1, 1], [], []>} : vector<8x32xf32>, vector<32x32xf32>, vector<8x32xf32> -> vector<8x32xf32>
    %13 = vector.broadcast %4 : vector<1x32xf32> to vector<8x32xf32>
    %14 = arith.addf %12, %13 : vector<8x32xf32>
    %cst_5 = arith.constant 0.000000e+00 : f32
    %15 = vector.broadcast %cst_5 : f32 to vector<8x32xf32>
    %16 = arith.maximumf %14, %15 : vector<8x32xf32>
    %cst_6 = arith.constant dense<0.000000e+00> : vector<8xf32>
    %17 = vector.multi_reduction <add>, %16, %cst_6 [1] : vector<8x32xf32> to vector<8xf32>
    %18 = vector.shape_cast %17 : vector<8xf32> to vector<8x1xf32>
    %cst_7 = arith.constant 3.200000e+01 : f32
    %19 = vector.broadcast %cst_7 : f32 to vector<8x1xf32>
    %20 = arith.divf %18, %19 : vector<8x1xf32>
    %21 = arith.mulf %16, %16 : vector<8x32xf32>
    %cst_8 = arith.constant dense<0.000000e+00> : vector<8xf32>
    %22 = vector.multi_reduction <add>, %21, %cst_8 [1] : vector<8x32xf32> to vector<8xf32>
    %23 = vector.shape_cast %22 : vector<8xf32> to vector<8x1xf32>
    %cst_9 = arith.constant 3.200000e+01 : f32
    %24 = vector.broadcast %cst_9 : f32 to vector<8x1xf32>
    %25 = arith.divf %23, %24 : vector<8x1xf32>
    %26 = arith.mulf %20, %20 : vector<8x1xf32>
    %27 = arith.subf %25, %26 : vector<8x1xf32>
    %cst_10 = arith.constant 0.000000e+00 : f32
    %28 = vector.broadcast %cst_10 : f32 to vector<8x1xf32>
    %29 = arith.maximumf %27, %28 : vector<8x1xf32>
    %30 = vector.broadcast %20 : vector<8x1xf32> to vector<8x32xf32>
    %31 = arith.subf %16, %30 : vector<8x32xf32>
    %cst_11 = arith.constant 9.99999974E-6 : f32
    %32 = vector.broadcast %cst_11 : f32 to vector<8x1xf32>
    %33 = arith.addf %29, %32 : vector<8x1xf32>
    %34 = math.rsqrt %33 : vector<8x1xf32>
    %35 = vector.broadcast %34 : vector<8x1xf32> to vector<8x32xf32>
    %36 = arith.mulf %31, %35 : vector<8x32xf32>
    %37 = vector.broadcast %5 : vector<1x32xf32> to vector<8x32xf32>
    %38 = arith.mulf %36, %37 : vector<8x32xf32>
    %39 = vector.broadcast %6 : vector<1x32xf32> to vector<8x32xf32>
    %40 = arith.addf %38, %39 : vector<8x32xf32>
    %cst_12 = arith.constant 0.000000e+00 : f32
    %41 = vector.broadcast %cst_12 : f32 to vector<8x32xf32>
    %42 = arith.maximumf %40, %41 : vector<8x32xf32>
    %c0_13 = arith.constant 0 : index
    %c0_14 = arith.constant 0 : index
    %43 = vector.load %arg3[%c0_13, %c0_14] : memref<32x32xf32, #tpu.memory_space<vmem>>, vector<32x32xf32>
    %cst_15 = arith.constant dense<0.000000e+00> : vector<8x32xf32>
    %44 = tpu.matmul %42, %43, %cst_15 {dimension_numbers = #tpu.dot_dimension_numbers<[1], [0], [0], [1], [0, 0, 1, 1], [], []>} : vector<8x32xf32>, vector<32x32xf32>, vector<8x32xf32> -> vector<8x32xf32>
    %45 = vector.broadcast %7 : vector<1x32xf32> to vector<8x32xf32>
    %46 = arith.addf %44, %45 : vector<8x32xf32>
    %cst_16 = arith.constant 0.000000e+00 : f32
    %47 = vector.broadcast %cst_16 : f32 to vector<8x32xf32>
    %48 = arith.maximumf %46, %47 : vector<8x32xf32>
    %cst_17 = arith.constant dense<0.000000e+00> : vector<8xf32>
    %49 = vector.multi_reduction <add>, %48, %cst_17 [1] : vector<8x32xf32> to vector<8xf32>
    %50 = vector.shape_cast %49 : vector<8xf32> to vector<8x1xf32>
    %cst_18 = arith.constant 3.200000e+01 : f32
    %51 = vector.broadcast %cst_18 : f32 to vector<8x1xf32>
    %52 = arith.divf %50, %51 : vector<8x1xf32>
    %53 = arith.mulf %48, %48 : vector<8x32xf32>
    %cst_19 = arith.constant dense<0.000000e+00> : vector<8xf32>
    %54 = vector.multi_reduction <add>, %53, %cst_19 [1] : vector<8x32xf32> to vector<8xf32>
    %55 = vector.shape_cast %54 : vector<8xf32> to vector<8x1xf32>
    %cst_20 = arith.constant 3.200000e+01 : f32
    %56 = vector.broadcast %cst_20 : f32 to vector<8x1xf32>
    %57 = arith.divf %55, %56 : vector<8x1xf32>
    %58 = arith.mulf %52, %52 : vector<8x1xf32>
    %59 = arith.subf %57, %58 : vector<8x1xf32>
    %cst_21 = arith.constant 0.000000e+00 : f32
    %60 = vector.broadcast %cst_21 : f32 to vector<8x1xf32>
    %61 = arith.maximumf %59, %60 : vector<8x1xf32>
    %62 = vector.broadcast %52 : vector<8x1xf32> to vector<8x32xf32>
    %63 = arith.subf %48, %62 : vector<8x32xf32>
    %cst_22 = arith.constant 9.99999974E-6 : f32
    %64 = vector.broadcast %cst_22 : f32 to vector<8x1xf32>
    %65 = arith.addf %61, %64 : vector<8x1xf32>
    %66 = math.rsqrt %65 : vector<8x1xf32>
    %67 = vector.broadcast %66 : vector<8x1xf32> to vector<8x32xf32>
    %68 = arith.mulf %63, %67 : vector<8x32xf32>
    %69 = vector.broadcast %8 : vector<1x32xf32> to vector<8x32xf32>
    %70 = arith.mulf %68, %69 : vector<8x32xf32>
    %71 = vector.broadcast %9 : vector<1x32xf32> to vector<8x32xf32>
    %72 = arith.addf %70, %71 : vector<8x32xf32>
    %cst_23 = arith.constant 0.000000e+00 : f32
    %73 = vector.broadcast %cst_23 : f32 to vector<8x32xf32>
    %74 = arith.maximumf %72, %73 : vector<8x32xf32>
    %c0_24 = arith.constant 0 : index
    %c0_25 = arith.constant 0 : index
    %75 = vector.load %arg4[%c0_24, %c0_25] : memref<32x16xf32, #tpu.memory_space<vmem>>, vector<32x16xf32>
    %cst_26 = arith.constant dense<0.000000e+00> : vector<8x16xf32>
    %76 = tpu.matmul %74, %75, %cst_26 {dimension_numbers = #tpu.dot_dimension_numbers<[1], [0], [0], [1], [0, 0, 1, 1], [], []>} : vector<8x32xf32>, vector<32x16xf32>, vector<8x16xf32> -> vector<8x16xf32>
    %77 = vector.broadcast %10 : vector<1x16xf32> to vector<8x16xf32>
    %78 = arith.addf %76, %77 : vector<8x16xf32>
    %79 = vector.extract_strided_slice %78 {offsets = [0, 0], sizes = [8, 8], strides = [1, 1]} : vector<8x16xf32> to vector<8x8xf32>
    %80 = math.tanh %79 : vector<8x8xf32>
    %81 = vector.extract_strided_slice %78 {offsets = [0, 8], sizes = [8, 8], strides = [1, 1]} : vector<8x16xf32> to vector<8x8xf32>
    %cst_27 = arith.constant 0.000000e+00 : f32
    %82 = vector.broadcast %cst_27 : f32 to vector<8x8xf32>
    %83 = arith.maximumf %81, %82 : vector<8x8xf32>
    %84 = math.absf %81 : vector<8x8xf32>
    %cst_28 = arith.constant 0.000000e+00 : f32
    %85 = vector.broadcast %cst_28 : f32 to vector<8x8xf32>
    %86 = arith.subf %85, %84 : vector<8x8xf32>
    %87 = math.exp %86 : vector<8x8xf32>
    %88 = math.log1p %87 : vector<8x8xf32>
    %89 = arith.addf %83, %88 : vector<8x8xf32>
    %cst_29 = arith.constant 0.00999999977 : f32
    %90 = vector.broadcast %cst_29 : f32 to vector<8x8xf32>
    %91 = arith.addf %89, %90 : vector<8x8xf32>
    %92 = arith.mulf %91, %2 : vector<8x8xf32>
    %93 = arith.addf %80, %92 : vector<8x8xf32>
    %94 = math.tanh %93 : vector<8x8xf32>
    %cst_30 = arith.constant -5.000000e-01 : f32
    %95 = vector.broadcast %cst_30 : f32 to vector<8x8xf32>
    %96 = arith.mulf %95, %2 : vector<8x8xf32>
    %97 = arith.mulf %96, %2 : vector<8x8xf32>
    %98 = math.log %91 : vector<8x8xf32>
    %99 = arith.subf %97, %98 : vector<8x8xf32>
    %cst_31 = arith.constant 5.000000e-01 : f32
    %cst_32 = arith.constant 1.83787704 : f32
    %100 = arith.mulf %cst_31, %cst_32 : f32
    %101 = vector.broadcast %100 : f32 to vector<8x8xf32>
    %102 = arith.subf %99, %101 : vector<8x8xf32>
    %cst_33 = arith.constant 0.693147182 : f32
    %103 = vector.broadcast %cst_33 : f32 to vector<8x8xf32>
    %104 = arith.subf %103, %93 : vector<8x8xf32>
    %cst_34 = arith.constant -2.000000e+00 : f32
    %105 = vector.broadcast %cst_34 : f32 to vector<8x8xf32>
    %106 = arith.mulf %105, %93 : vector<8x8xf32>
    %cst_35 = arith.constant 0.000000e+00 : f32
    %107 = vector.broadcast %cst_35 : f32 to vector<8x8xf32>
    %108 = arith.maximumf %106, %107 : vector<8x8xf32>
    %109 = math.absf %106 : vector<8x8xf32>
    %cst_36 = arith.constant 0.000000e+00 : f32
    %110 = vector.broadcast %cst_36 : f32 to vector<8x8xf32>
    %111 = arith.subf %110, %109 : vector<8x8xf32>
    %112 = math.exp %111 : vector<8x8xf32>
    %113 = math.log1p %112 : vector<8x8xf32>
    %114 = arith.addf %108, %113 : vector<8x8xf32>
    %115 = arith.subf %104, %114 : vector<8x8xf32>
    %cst_37 = arith.constant 2.000000e+00 : f32
    %116 = vector.broadcast %cst_37 : f32 to vector<8x8xf32>
    %117 = arith.mulf %116, %115 : vector<8x8xf32>
    %118 = arith.subf %102, %117 : vector<8x8xf32>
    %119 = tpu.concatenate %94, %118 in 1 : vector<8x8xf32>, vector<8x8xf32> -> vector<8x16xf32>
    %c0_38 = arith.constant 0 : index
    %c0_39 = arith.constant 0 : index
    %120 = vector.load %arg6[%c0_38, %c0_39] : memref<8x16xf32, #tpu.memory_space<vmem>>, vector<8x16xf32>
    tpu.vector_store %arg6[%c0_38, %c0_39], %119 {strides = array<i32>} : memref<8x16xf32, #tpu.memory_space<vmem>>, vector<8x16xf32>,
    return
  }
  func.func @transform_0(%arg0: i32) -> (i32, i32) {
    %c0_i32 = arith.constant 0 : i32
    %c0_i32_0 = arith.constant 0 : i32
    return %arg0, %c0_i32 : i32, i32
  }
  func.func @transform_1(%arg0: i32) -> (i32, i32) {
    %c0_i32 = arith.constant 0 : i32
    %c0_i32_0 = arith.constant 0 : i32
    %c0_i32_1 = arith.constant 0 : i32
    return %c0_i32, %c0_i32_0 : i32, i32
  }
  func.func @transform_2(%arg0: i32) -> (i32, i32) {
    %c0_i32 = arith.constant 0 : i32
    %c0_i32_0 = arith.constant 0 : i32
    %c0_i32_1 = arith.constant 0 : i32
    return %c0_i32, %c0_i32_0 : i32, i32
  }
  func.func @transform_3(%arg0: i32) -> (i32, i32) {
    %c0_i32 = arith.constant 0 : i32
    %c0_i32_0 = arith.constant 0 : i32
    %c0_i32_1 = arith.constant 0 : i32
    return %c0_i32, %c0_i32_0 : i32, i32
  }
  func.func @transform_4(%arg0: i32) -> (i32, i32) {
    %c0_i32 = arith.constant 0 : i32
    %c0_i32_0 = arith.constant 0 : i32
    %c0_i32_1 = arith.constant 0 : i32
    return %c0_i32, %c0_i32_0 : i32, i32
  }
  func.func @transform_5(%arg0: i32) -> (i32, i32) {
    %c0_i32 = arith.constant 0 : i32
    %c0_i32_0 = arith.constant 0 : i32
    return %arg0, %c0_i32 : i32, i32
  }
}

</mosaic_0001>

<bundles_post_ra>
// kernel: tpu_custom_call.1
= control target key start
LH: loop header
LB: loop body
LE: loop exit
PB: predicated region body
PF: predicated region fallthrough
CT: control target
= control target key end

     0   :  { %10 = vsyncpa [#allocation3], 0  ;;  %s706_s0 = inlined_call_operand.vmem [shape: f32[8,40], index: 0, kind: input, shape index: {}]   ;;  %s707_s1 = inlined_call_operand.vmem [shape: f32[32,32], index: 1, kind: input, shape index: {}]   ;;  %s708_s2 = inlined_call_operand.hbm [shape: f32[32,32], index: 2, kind: input, shape index: {}]   ;;  %s709_s3 = inlined_call_operand.vmem [shape: f32[32,16], index: 3, kind: input, shape index: {}]   ;;  %s710_s4 = inlined_call_operand.vmem [shape: f32[8,32], index: 4, kind: input, shape index: {}]   ;;  %s711_s5 = inlined_call_operand.hbm [shape: f32[8,16], index: 5, kind: output, shape index: {}]  }
   0x1   :  { %11 = vsyncpa [#allocation4], 0  ;;  %s569_s18 = smov [#allocation2]   ;;  %s521_s22 = scalar_lea.hbm %s708_s2, 512 }
   0x2   :  { %s21_s19 = sshll.u32 %s569_s18, 4  ;;  %p522_p0 = scmp.ne.s32.totalorder %s708_s2, %s521_s22  ;;  %s22_s19 = int_to_ptr.vmem [resolvable:$true] %s21_s19 }
   0x3   :  { %p525_p1 = scmp.lt.u32.totalorder %s521_s22, %s708_s2 }
   0x5   :  { %p527_p2 = pnand %p525_p1, %p522_p0 }
   0x7   :  { %530 = shalt.err (!%p527_p2)
}
   0x8   :  { %s531_s27 = scalar_lea.vmem %s22_s19, 512  ;;  %p536_p4 = scmp.lt.s32.totalorder %s22_s19, %s22_s19 }
   0x9   :  { %p532_p3 = scmp.ne.s32.totalorder %s22_s19, %s531_s27  ;;  %p537_p5 = scmp.lt.s32.totalorder %s531_s27, %s531_s27 }
   0xb   :  { %p538_p6 = por %p537_p5, %p536_p4 }
   0xd   :  { %p539_p7 = pnand %p538_p6, %p532_p3 }
   0xf   :  { %542 = shalt.err (!%p539_p7)
}
  0x10   :  { %s570_s28 = smov 128   ;;  %s571_s29 = smov 8  }
  0x11   :  { %27 = dma.hbm_to_vmem [thread:$0]  %s708_s2, 512, %s22_s19, [#allocation3], %s570_s28, %s570_s28, %s571_s29  }
  0x12   :  { %565 = dma.done.wait [#allocation3], 512  }
  0x13   :  { %566 = vsyncadd [#allocation3], 4294966784  ;;  %v572_v0 = vmov 0.0|0.0   ;;  %vm573_vm0 = vmmov 0   ;;  %v574_v1 = vmov 0.0   ;;  %v37_v2 = vld [vmem:[%s707_s1] sm:$0xff]  ;;  %v41_v9 = vlaneseq }
  0x14   :  { %474 = vmatprep.subr.bf16.mxu0 %v572_v0  ;;  %449 = vmatprep.mubr.msk.f32.mxu0 %vm573_vm0, %v574_v1  ;;  %v38_v3 = vld [vmem:[%s707_s1 + $0x8] sm:$0xff]  ;;  %v39_v4 = vld [vmem:[%s707_s1 + $0x10] sm:$0xff]  ;;  %v40_v6 = vld [vmem:[%s707_s1 + $0x18] sm:$0xff]  ;;  %vm45_vm1 = vcmask 261120   ;;  %s575_s23 = smov 104   ;;  %s577_s24 = smov 24  }
  0x15   :  { %480 = vmatprep.subr.bf16.mxu1 %v572_v0  ;;  %460 = vmatprep.mubr.msk.f32.mxu1 %vm573_vm0, %v574_v1  ;;  %v475_v5 = vpack.c.bf16 %v38_v3, %v37_v2  ;;  %v478_v7 = vpack.c.bf16 %v40_v6, %v39_v4  ;;  %v642_v8 = vld [vmem:[%s706_s0] sm:$0xff]  ;;  %v648_v10 = vshrl.u32 %v41_v9, 7  ;;  %v149_v22 = vld [vmem:[#allocation2 + $0x8] sm:$0xff]  ;;  %v150_v23 = vld [vmem:[#allocation2 + $0x10] sm:$0xff]  ;;  %s578_s25 = smov 32   ;;  %s579_s26 = smov [#allocation5]  }
  0x16   :  { %v654_v12 = vld [vmem:[%s710_s4] sm:$0xff]  ;;  %v151_v25 = vld [vmem:[#allocation2 + $0x18] sm:$0xff]  ;;  %v258_v55 = vld [vmem:[%s709_s3 + $0x8] sm:$0xff]  ;;  %s413_s27 = sshll.u32 %s579_s26, 4  ;;  %vm403_vm4 = vcmask 64512   ;;  %vm405_vm5 = vcmask 130048   ;;  %s414_s27 = int_to_ptr.vmem [resolvable:$true] %s413_s27 }
  0x17   :  { %476 = vmatpush3.bf16.msra.mxu0 %v475_v5  ;;  %v43_v11 = vsub.s32 0, %v648_v10  ;;  %v148_v21 = vld [vmem:[#allocation2] sm:$0xff]  ;;  %v484_v26 = vpack.c.bf16 %v151_v25, %v150_v23  ;;  %v139_v35 = vsub.s32 1, %v648_v10  ;;  %v144_v36 = vsub.s32 2, %v648_v10  ;;  %v259_v57 = vld [vmem:[%s709_s3 + $0x10] sm:$0xff]  ;;  %v260_v58 = vld [vmem:[%s709_s3 + $0x18] sm:$0xff]  ;;  %p548_p9 = scmp.lt.s32.totalorder %s414_s27, %s414_s27 }
  0x18   :  { %477 = vmatprep.subr.bf16.mxu0 %v572_v0  ;;  %v481_v24 = vpack.c.bf16 %v149_v22, %v148_v21  ;;  %v154_v45 = vsub.s32 3, %v648_v10  ;;  %v257_v54 = vld [vmem:[%s709_s3] sm:$0xff]  ;;  %v490_v59 = vpack.c.bf16 %v260_v58, %v259_v57  ;;  %v248_v5 = vsub.s32 4, %v648_v10  ;;  %s576_s3 = smov 120   ;;  %s543_s28 = scalar_lea.vmem %s414_s27, 128 }
  0x19   :  { %v44_v13 = vrot.slane %v654_v12, %v43_v11  ;;  %v140_v38 = vrot.slane %v654_v12, %v139_v35  ;;  %v145_v41 = vrot.slane %v654_v12, %v144_v36  ;;  %v487_v56 = vpack.c.bf16 %v258_v55, %v257_v54  ;;  %p544_p8 = scmp.ne.s32.totalorder %s414_s27, %s543_s28  ;;  %p549_p10 = scmp.lt.s32.totalorder %s543_s28, %s543_s28 }
  0x1a   :  { %482 = vmatpush3.bf16.msra.mxu1 %v481_v24  ;;  %v155_v46 = vrot.slane %v654_v12, %v154_v45  ;;  %v253_v6 = vsub.s32 5, %v648_v10 }
  0x1b   :  { %479 = vmatpush3.bf16.msra.mxu0 %v478_v7  ;;  %483 = vmatprep.subr.bf16.mxu1 %v572_v0  ;;  %p550_p11 = por %p549_p10, %p548_p9 }
  0x1c   :  { %486 = vmatprep.subr.bf16.mxu0 %v572_v0 }
  0x1d   :  { %p551_p12 = pnand %p550_p11, %p544_p8 }
  0x1e   :  { %450 = vmatmul.mubr.msk.f32.vlgmr.msra.gmra.mrb[0].mxu0 %vm45_vm1, %v642_v8  ;;  %485 = vmatpush3.bf16.msra.mxu1 %v484_v26 }
  0x1f   :  { %471 = vmatprep.mubr.msk.f32.mxu0 %vm573_vm0, %v574_v1  ;;  %488 = vmatpush3.bf16.msra.mxu0 %v487_v56 }
  0x20   :  { %489 = vmatprep.subr.bf16.mxu0 %v572_v0  ;;  %v249_v0 = vrot.slane %v654_v12, %v248_v5 }
  0x23   :  { %491 = vmatpush3.bf16.msra.mxu0 %v490_v59 }
  0xf1   :  { %v115_v14 = vpop.f32.mrb[0].mxu0 }
  0xf2   :  { %v116_v15 = vadd.f32 %v115_v14, %v44_v13  ;;  %v451_v16 = vpop.f32.mrb[1].mxu0  ;;  %v254_v13 = vrot.slane %v654_v12, %v253_v6 }
  0xf4   :  { %v119_v17 = vmax.f32 %v116_v15, 0.0 }
  0xf6   :  { %v120_v18 = vsel %vm45_vm1, %v119_v17, 0.0  ;;  %v125_v19 = vmul.f32 %v119_v17, %v119_v17 }
  0xf7   :  { %121 = vadd.xlane.f32.xlu0 %v120_v18 }
  0xf8   :  { %v126_v20 = vsel %vm45_vm1, %v125_v19, 0.0 }
  0xfb   :  { %127 = vadd.xlane.f32.xlu0 %v126_v20 }
 0x111   :  { %355 = vrot.lane.b32.xlu0 %v642_v8, %s575_s23 }
 0x184   :  { %v122_v27 = vpop.xlane.xlu0 %121 }
 0x185   :  { %v124_v28 = vmul.f32 0.03125, %v122_v27 }
 0x187   :  { %v130_v30 = vmul.f32 %v124_v28, %v124_v28  ;;  %v133_v37 = vsub.f32 %v119_v17, %v124_v28  ;;  %v263_v17 = vsub.s32 6, %v648_v10 }
 0x188   :  { %v128_v29 = vpop.xlane.xlu0 %127 }
 0x189   :  { %v129_v31 = vmul.f32 0.03125, %v128_v29  ;;  %v264_v18 = vrot.slane %v654_v12, %v263_v17 }
 0x18b   :  { %v131_v32 = vsub.f32 %v129_v31, %v130_v30 }
 0x18d   :  { %v132_v33 = vmax.f32 %v131_v32, 0.0 }
 0x18f   :  { %v134_v34 = vadd.f32 1e-05, %v132_v33 }
 0x191   :  { %503 = vrsqrt.f32 %v134_v34  ;;  %v356_v34 = vpop.permute.xlu0 %355 }
 0x19b   :  { %v504_v39 = vpop.eup %503 }
 0x19c   :  { %v136_v40 = vmul.f32 %v504_v39, %v133_v37 }
 0x19e   :  { %v141_v42 = vmul.f32 %v140_v38, %v136_v40 }
 0x1a0   :  { %v146_v43 = vadd.f32 %v145_v41, %v141_v42 }
 0x1a2   :  { %v147_v44 = vmax.f32 %v146_v43, 0.0 }
 0x1a4   :  { %461 = vmatmul.mubr.msk.f32.vlgmr.msra.gmra.mrb[0].mxu1 %vm45_vm1, %v147_v44 }
 0x277   :  { %v225_v47 = vpop.f32.mrb[0].mxu1 }
 0x278   :  { %v226_v48 = vadd.f32 %v225_v47, %v155_v46  ;;  %v462_v49 = vpop.f32.mrb[1].mxu1 }
 0x27a   :  { %v229_v50 = vmax.f32 %v226_v48, 0.0 }
 0x27c   :  { %v230_v51 = vsel %vm45_vm1, %v229_v50, 0.0  ;;  %v234_v52 = vmul.f32 %v229_v50, %v229_v50 }
 0x27d   :  { %231 = vadd.xlane.f32.xlu1 %v230_v51 }
 0x27e   :  { %v235_v53 = vsel %vm45_vm1, %v234_v52, 0.0 }
 0x281   :  { %236 = vadd.xlane.f32.xlu1 %v235_v53 }
 0x30a   :  { %v232_v60 = vpop.xlane.xlu1 %231 }
 0x30b   :  { %v233_v61 = vmul.f32 0.03125, %v232_v60  ;;  %v365_v60 = vmul.f32 -0.5, %v642_v8 }
 0x30d   :  { %v239_v63 = vmul.f32 %v233_v61, %v233_v61  ;;  %v242_v7 = vsub.f32 %v229_v50, %v233_v61  ;;  %v366_v61 = vmul.f32 %v365_v60, %v642_v8 }
 0x30e   :  { %v237_v62 = vpop.xlane.xlu1 %236 }
 0x30f   :  { %v238_v1 = vmul.f32 0.03125, %v237_v62 }
 0x311   :  { %v240_v2 = vsub.f32 %v238_v1, %v239_v63 }
 0x313   :  { %v241_v3 = vmax.f32 %v240_v2, 0.0 }
 0x315   :  { %v243_v4 = vadd.f32 1e-05, %v241_v3 }
 0x317   :  { %505 = vrsqrt.f32 %v243_v4 }
 0x321   :  { %v506_v9 = vpop.eup %505 }
 0x322   :  { %v245_v11 = vmul.f32 %v506_v9, %v242_v7 }
 0x324   :  { %v250_v14 = vmul.f32 %v249_v0, %v245_v11 }
 0x326   :  { %v255_v15 = vadd.f32 %v254_v13, %v250_v14 }
 0x328   :  { %v256_v16 = vmax.f32 %v255_v15, 0.0 }
 0x32a   :  { %472 = vmatmul.mubr.msk.f32.vlgmr.msra.gmra.mrb[2].mxu0 %vm45_vm1, %v256_v16 }
 0x3fd   :  { %v334_v19 = vpop.f32.mrb[2].mxu0 }
 0x3fe   :  { %v335_v20 = vadd.f32 %v334_v19, %v264_v18  ;;  %v473_v21 = vpop.f32.mrb[3].mxu0 }
 0x400   :  { %v340_v22 = vand.u32 2147483647, %v335_v20  ;;  %v339_v33 = vmax.f32 %v335_v20, 0.0 }
 0x402   :  { %v341_v23 = vsub.f32 0.0, %v340_v22 }
 0x404   :  { %v342_v24 = vmul.f32 1.442695, %v341_v23 }
 0x406   :  { %507 = vpow2.f32 %v342_v24 }
 0x410   :  { %v508_v25 = vpop.eup %507 }
 0x411   :  { %v344_v26 = vadd.f32 1.0, %v508_v25  ;;  %v347_v27 = vmul.f32 -0.5, %v508_v25  ;;  %v350_v29 = vand.u32 2147483647, %v508_v25 }
 0x413   :  { %509 = vlog2.f32 %v344_v26  ;;  %v348_v28 = vadd.f32 1.0, %v347_v27  ;;  %vm351_vm2 = vcmp.lt.f32.partialorder %v350_v29, 0.0004427343 }
 0x415   :  { %v349_v32 = vmul.f32 %v508_v25, %v348_v28 }
 0x41d   :  { %v510_v30 = vpop.eup %509 }
 0x41e   :  { %v346_v31 = vmul.f32 0.6931472, %v510_v30 }
 0x420   :  { %v352_v10 = vsel %vm351_vm2, %v349_v32, %v346_v31 }
 0x421   :  { %v353_v12 = vadd.f32 %v352_v10, %v339_v33 }
 0x423   :  { %v354_v35 = vadd.f32 0.01, %v353_v12 }
 0x425   :  { %v358_v36 = vmul.f32 %v356_v34, %v354_v35  ;;  %511 = vlog2.f32 %v354_v35 }
 0x426   :  { %513 = vtanh.f32 %v335_v20 }
 0x427   :  { %360 = vrot.lane.b32.xlu1 %v358_v36, %s576_s3 }
 0x42f   :  { %v512_v37 = vpop.eup %511 }
 0x430   :  { %v368_v38 = vmul.f32 0.6931472, %v512_v37  ;;  %v514_v39 = vpop.eup %513 }
 0x432   :  { %370 = vrot.lane.b32.xlu1 %v368_v38, %s577_s24 }
 0x499   :  { %v361_v40 = vpop.permute.xlu1 %360 }
 0x49a   :  { %v363_v41 = vadd.f32 %v514_v39, %v361_v40 }
 0x49c   :  { %v376_v42 = vmul.f32 -2.0, %v363_v41  ;;  %v375_v56 = vsub.f32 0.6931472, %v363_v41 }
 0x49e   :  { %v378_v43 = vand.u32 2147483647, %v376_v42  ;;  %v377_v54 = vmax.f32 %v376_v42, 0.0 }
 0x4a0   :  { %v379_v44 = vsub.f32 0.0, %v378_v43 }
 0x4a2   :  { %v380_v45 = vmul.f32 1.442695, %v379_v44 }
 0x4a4   :  { %515 = vpow2.f32 %v380_v45  ;;  %v371_v62 = vpop.permute.xlu1 %370 }
 0x4a5   :  { %v373_v63 = vsub.f32 %v366_v61, %v371_v62 }
 0x4a7   :  { %v425_v1 = vadd.f32 -0.9189385, %v373_v63 }
 0x4ae   :  { %v516_v46 = vpop.eup %515 }
 0x4af   :  { %v382_v47 = vadd.f32 1.0, %v516_v46  ;;  %v385_v48 = vmul.f32 -0.5, %v516_v46  ;;  %v388_v50 = vand.u32 2147483647, %v516_v46 }
 0x4b1   :  { %517 = vlog2.f32 %v382_v47  ;;  %v386_v49 = vadd.f32 1.0, %v385_v48  ;;  %vm389_vm3 = vcmp.lt.f32.partialorder %v388_v50, 0.0004427343 }
 0x4b2   :  { %519 = vtanh.f32 %v363_v41 }
 0x4b3   :  { %v387_v53 = vmul.f32 %v516_v46, %v386_v49 }
 0x4bb   :  { %v518_v51 = vpop.eup %517 }
 0x4bc   :  { %v384_v52 = vmul.f32 0.6931472, %v518_v51  ;;  %v520_v4 = vpop.eup %519 }
 0x4be   :  { %v390_v55 = vsel %vm389_vm3, %v387_v53, %v384_v52 }
 0x4bf   :  { %v391_v57 = vadd.f32 %v390_v55, %v377_v54 }
 0x4c1   :  { %v392_v58 = vsub.f32 %v375_v56, %v391_v57 }
 0x4c3   :  { %v393_v59 = vmul.f32 2.0, %v392_v58 }
 0x4c5   :  { %395 = vrot.lane.b32.xlu1 %v393_v59, %s578_s25 }
 0x537   :  { %v396_v2 = vpop.permute.xlu1 %395 }
 0x538   :  { %v398_v3 = vsub.f32 %v425_v1, %v396_v2 }
 0x53a   :  { %400 = vrot.lane.b32.xlu0 %v398_v3, %s575_s23 }
 0x5ac   :  { %v401_v5 = vpop.permute.xlu0 %400 }
 0x5ad   :  { %v404_v6 = vsel %vm403_vm4, %v520_v4, %v401_v5 }
 0x5ae   :  { %406 = vst.msk [vmem:[#allocation5] sm:$0xff] %vm405_vm5, %v404_v6 }
 0x5af   :  { %554 = shalt.err (!%p551_p12)
}
 0x5b0   :  { %s555_s6 = scalar_lea.hbm %s711_s5, 128 }
 0x5b1   :  { %p556_p13 = scmp.ne.s32.totalorder %s711_s5, %s555_s6  ;;  %p559_p0 = scmp.lt.u32.totalorder %s555_s6, %s711_s5 }
 0x5b3   :  { %p561_p1 = pnand %p559_p0, %p556_p13 }
 0x5b5   :  { %564 = shalt.err (!%p561_p1)
}
 0x5b6   :  { %416 = dma.vmem_to_hbm [thread:$0]  %s414_s27, 128, %s711_s5, [#allocation4]  }
 0x5b7   :  { %567 = dma.done.wait [#allocation4], 128  }
 0x5b8   :  { %568 = vsyncadd [#allocation4], 4294967168 }
 0x5b9   :  { %420 = vsyncpa [#allocation3], 1 }
 0x5ba   :  { %421 = vsyncpa [#allocation4], 1 }

</bundles_post_ra>
